<compile_context>
chip_gen: v5e
topology: v5e:2x2
jax: 0.10.0
libtpu: 0.0.40
codegen_flags: <defaults>
</compile_context>

<pallas_src>
import functools

import jax
import jax.numpy as jnp
from jax.experimental import pallas as pl
from jax.experimental.pallas import tpu as pltpu

LANE = 128


def _round_up(x, m):
    return ((x + m - 1) // m) * m


def policy_mlp_kernel(x_ref, w1_ref, b1_ref, w2_ref, b2_ref, w3_ref, b3_ref, o_ref):
    # fc1 + ReLU  (bf16 MXU inputs, f32 accumulate / f32 elementwise)
    x = x_ref[...].astype(jnp.bfloat16)
    h1 = jnp.dot(x, w1_ref[...], preferred_element_type=jnp.float32) + b1_ref[...]
    h1 = jnp.maximum(h1, 0.0)
    # fc2 + ReLU
    h2 = jnp.dot(h1.astype(jnp.bfloat16), w2_ref[...],
                 preferred_element_type=jnp.float32) + b2_ref[...]
    h2 = jnp.maximum(h2, 0.0)
    # fc3 + tanh  (output columns are lane-padded; extra columns are zeros)
    h3 = jnp.dot(h2.astype(jnp.bfloat16), w3_ref[...],
                 preferred_element_type=jnp.float32) + b3_ref[...]
    o_ref[...] = jnp.tanh(h3).astype(o_ref.dtype)


def prepare_kernel_params(params):
    """f32 (in,out)/(1,out) params -> bf16 weights + f32 biases, fc3 padded to 128 lanes.

    Do this once outside the hot loop so weights stay bf16-resident.
    """
    w1, b1, w2, b2, w3, b3 = params
    action_dim = w3.shape[1]
    out_pad = _round_up(action_dim, LANE)
    if out_pad != action_dim:
        w3 = jnp.pad(w3, ((0, 0), (0, out_pad - action_dim)))
        b3 = jnp.pad(b3, ((0, 0), (0, out_pad - action_dim)))
    kparams = (w1.astype(jnp.bfloat16), b1.astype(jnp.float32),
               w2.astype(jnp.bfloat16), b2.astype(jnp.float32),
               w3.astype(jnp.bfloat16), b3.astype(jnp.float32))
    return kparams, action_dim


def _choose_tile_b(B):
    """Batch tile heuristic (kernel is grid-overhead / HBM-store bound, not MXU bound)."""
    if B <= 512:
        # Single grid step, block spans the full batch axis (legal even if
        # B % 8 != 0 because block dim == full array dim): no pad, no slice.
        return B
    # Large batch: >=2 big steps so both v7x TensorCores get work; cap tile at
    # ~2048 rows (still only a few MiB of VMEM) and keep it a multiple of 16.
    n_steps = max(2, pl.cdiv(B, 2048))
    return _round_up(pl.cdiv(B, n_steps), 16)


@functools.partial(jax.jit, static_argnames=("action_dim", "tile_b", "out_dtype"))
def policy_network_forward(state, kparams, *, action_dim, tile_b=None,
                           out_dtype=jnp.float32):
    """state: (B, state_dim) f32 -> (B, action_dim) out_dtype."""
    w1, b1, w2, b2, w3, b3 = kparams
    B, state_dim = state.shape
    h1, h2 = w1.shape[1], w2.shape[1]
    out_pad = w3.shape[1]

    if tile_b is None:
        tile_b = _choose_tile_b(B)
    else:
        # Enforce (8,128) block divisibility + bf16 sublane packing.
        tile_b = max(16, _round_up(int(tile_b), 16))

    if tile_b >= B:
        # Tiny/medium-batch fast path: one grid step, no batch padding.
        tile_b, b_pad = B, B
        x = state
    else:
        b_pad = _round_up(B, tile_b)
        x = jnp.pad(state, ((0, b_pad - B), (0, 0))) if b_pad != B else state
    grid = (b_pad // tile_b,)

    def resident(shape):  # weight/bias block: same block every grid step -> VMEM-resident
        return pl.BlockSpec(shape, lambda i: (0, 0))

    out_bytes = jnp.dtype(out_dtype).itemsize
    cost = pl.CostEstimate(
        flops=2 * b_pad * (state_dim * h1 + h1 * h2 + h2 * out_pad),
        transcendentals=b_pad * out_pad,
        bytes_accessed=(x.size * 4
                        + (w1.size + w2.size + w3.size) * 2
                        + (b1.size + b2.size + b3.size) * 4
                        + b_pad * out_pad * out_bytes),
    )

    out = pl.pallas_call(
        policy_mlp_kernel,
        out_shape=jax.ShapeDtypeStruct((b_pad, out_pad), out_dtype),
        grid=grid,
        in_specs=[
            pl.BlockSpec((tile_b, state_dim), lambda i: (i, 0)),  # x: batch-tiled
            resident((state_dim, h1)), resident((1, h1)),         # fc1
            resident((h1, h2)), resident((1, h2)),                # fc2
            resident((h2, out_pad)), resident((1, out_pad)),      # fc3 (lane-padded)
        ],
        out_specs=pl.BlockSpec((tile_b, out_pad), lambda i: (i, 0)),
        compiler_params=pltpu.CompilerParams(
            dimension_semantics=("parallel",),
            vmem_limit_bytes=32 * 1024 * 1024,
        ),
        cost_estimate=cost,
    )(x, w1, b1, w2, b2, w3, b3)

    # Trim padding back to the module's contract.  Slice only the axes that
    # were actually padded (batch-axis slice is skipped on the fast path).
    if out_pad != action_dim:
        out = out[:, :action_dim] if b_pad == B else out[:B, :action_dim]
    elif b_pad != B:
        out = out[:B]
    return out


def init_params(key, state_dim, action_dim):
    """Deterministic init mimicking PyTorch nn.Linear default U(-1/sqrt(fan_in), 1/sqrt(fan_in))."""
    dims = [(state_dim, 256), (256, 128), (128, action_dim)]
    params = []
    for fan_in, fan_out in dims:
        key, kw, kb = jax.random.split(key, 3)
        bound = 1.0 / jnp.sqrt(jnp.float32(fan_in))
        w = jax.random.uniform(kw, (fan_in, fan_out), jnp.float32, -bound, bound)
        b = jax.random.uniform(kb, (1, fan_out), jnp.float32, -bound, bound)
        params.extend([w, b])
    return tuple(params)


def policy_network_ref(state, params):
    w1, b1, w2, b2, w3, b3 = params
    x = jnp.maximum(state @ w1 + b1, 0.0)
    x = jnp.maximum(x @ w2 + b2, 0.0)
    return jnp.tanh(x @ w3 + b3)


if __name__ == "__main__":
    key = jax.random.PRNGKey(0)
    state_dim, action_dim = 8, 4

    params = init_params(key, state_dim, action_dim)
    kparams, action_dim = prepare_kernel_params(params)

    # 1) Tiny batch (RL inference style): single grid step, no pad / no batch slice.
    key, ks = jax.random.split(key)
    s_small = jax.random.normal(ks, (2, state_dim), jnp.float32)
    out_small = jax.block_until_ready(
        policy_network_forward(s_small, kparams, action_dim=action_dim))
    ref_small = policy_network_ref(s_small, params)
    assert out_small.shape == (2, action_dim)
    # bf16 matmul operands (f32 accumulation) vs. pure-f32 reference.
    assert jnp.allclose(out_small, ref_small, atol=2e-2, rtol=2e-2), \
        float(jnp.max(jnp.abs(out_small - ref_small)))

    # 2) Larger batch: exercises the multi-step batch grid (>=2 steps, megacore path).
    key, kb = jax.random.split(key)
    s_big = jax.random.normal(kb, (528, state_dim), jnp.float32)
    out_big = jax.block_until_ready(
        policy_network_forward(s_big, kparams, action_dim=action_dim))
    ref_big = policy_network_ref(s_big, params)
    assert out_big.shape == (528, action_dim)
    assert jnp.allclose(out_big, ref_big, atol=2e-2, rtol=2e-2), \
        float(jnp.max(jnp.abs(out_big - ref_big)))

    print("KERNEL_OK")
</pallas_src>

<mosaic_0001>
module attributes {stable_mosaic.version = 11 : i64} {
  func.func @policy_mlp_kernel(%arg0: i32, %arg1: memref<2x8xf32, #tpu.memory_space<vmem>>, %arg2: memref<8x256xbf16, #tpu.memory_space<vmem>>, %arg3: memref<1x256xf32, #tpu.memory_space<vmem>>, %arg4: memref<256x128xbf16, #tpu.memory_space<vmem>>, %arg5: memref<1x128xf32, #tpu.memory_space<vmem>>, %arg6: memref<128x128xbf16, #tpu.memory_space<vmem>>, %arg7: memref<1x128xf32, #tpu.memory_space<vmem>>, %arg8: memref<2x128xf32, #tpu.memory_space<vmem>>) attributes {dimension_semantics = [#tpu.dimension_semantics<parallel>], iteration_bounds = array<i64: 1>, scalar_prefetch = 0 : i64, scratch_operands = 0 : i64, tpu.core_type = #tpu.core_type<tc>, window_params = [{transform_indices = @transform_0, window_bounds = array<i64: 2, 8>}, {pipeline_mode = #tpu.pipeline_mode<synchronous>, transform_indices = @transform_1, window_bounds = array<i64: 8, 256>}, {pipeline_mode = #tpu.pipeline_mode<synchronous>, transform_indices = @transform_2, window_bounds = array<i64: 1, 256>}, {pipeline_mode = #tpu.pipeline_mode<synchronous>, transform_indices = @transform_3, window_bounds = array<i64: 256, 128>}, {pipeline_mode = #tpu.pipeline_mode<synchronous>, transform_indices = @transform_4, window_bounds = array<i64: 1, 128>}, {pipeline_mode = #tpu.pipeline_mode<synchronous>, transform_indices = @transform_5, window_bounds = array<i64: 128, 128>}, {pipeline_mode = #tpu.pipeline_mode<synchronous>, transform_indices = @transform_6, window_bounds = array<i64: 1, 128>}, {transform_indices = @transform_7, window_bounds = array<i64: 2, 128>}]} {
    %c0 = arith.constant 0 : index
    %c0_0 = arith.constant 0 : index
    %0 = vector.load %arg1[%c0, %c0_0] : memref<2x8xf32, #tpu.memory_space<vmem>>, vector<2x8xf32>
    %1 = arith.truncf %0 : vector<2x8xf32> to vector<2x8xbf16>
    %c0_1 = arith.constant 0 : index
    %c0_2 = arith.constant 0 : index
    %2 = vector.load %arg2[%c0_1, %c0_2] : memref<8x256xbf16, #tpu.memory_space<vmem>>, vector<8x256xbf16>
    %cst = arith.constant dense<0.000000e+00> : vector<2x256xf32>
    %3 = tpu.matmul %1, %2, %cst {dimension_numbers = #tpu.dot_dimension_numbers<[1], [0], [0], [1], [0, 0, 1, 1], [], []>} : vector<2x8xbf16>, vector<8x256xbf16>, vector<2x256xf32> -> vector<2x256xf32>
    %c0_3 = arith.constant 0 : index
    %c0_4 = arith.constant 0 : index
    %4 = vector.load %arg3[%c0_3, %c0_4] : memref<1x256xf32, #tpu.memory_space<vmem>>, vector<1x256xf32>
    %5 = vector.broadcast %4 : vector<1x256xf32> to vector<2x256xf32>
    %6 = arith.addf %3, %5 : vector<2x256xf32>
    %cst_5 = arith.constant 0.000000e+00 : f32
    %7 = vector.broadcast %cst_5 : f32 to vector<2x256xf32>
    %8 = arith.maximumf %6, %7 : vector<2x256xf32>
    %9 = arith.truncf %8 : vector<2x256xf32> to vector<2x256xbf16>
    %c0_6 = arith.constant 0 : index
    %c0_7 = arith.constant 0 : index
    %10 = vector.load %arg4[%c0_6, %c0_7] : memref<256x128xbf16, #tpu.memory_space<vmem>>, vector<256x128xbf16>
    %cst_8 = arith.constant dense<0.000000e+00> : vector<2x128xf32>
    %11 = tpu.matmul %9, %10, %cst_8 {dimension_numbers = #tpu.dot_dimension_numbers<[1], [0], [0], [1], [0, 0, 1, 1], [], []>} : vector<2x256xbf16>, vector<256x128xbf16>, vector<2x128xf32> -> vector<2x128xf32>
    %c0_9 = arith.constant 0 : index
    %c0_10 = arith.constant 0 : index
    %12 = vector.load %arg5[%c0_9, %c0_10] : memref<1x128xf32, #tpu.memory_space<vmem>>, vector<1x128xf32>
    %13 = vector.broadcast %12 : vector<1x128xf32> to vector<2x128xf32>
    %14 = arith.addf %11, %13 : vector<2x128xf32>
    %cst_11 = arith.constant 0.000000e+00 : f32
    %15 = vector.broadcast %cst_11 : f32 to vector<2x128xf32>
    %16 = arith.maximumf %14, %15 : vector<2x128xf32>
    %17 = arith.truncf %16 : vector<2x128xf32> to vector<2x128xbf16>
    %c0_12 = arith.constant 0 : index
    %c0_13 = arith.constant 0 : index
    %18 = vector.load %arg6[%c0_12, %c0_13] : memref<128x128xbf16, #tpu.memory_space<vmem>>, vector<128x128xbf16>
    %cst_14 = arith.constant dense<0.000000e+00> : vector<2x128xf32>
    %19 = tpu.matmul %17, %18, %cst_14 {dimension_numbers = #tpu.dot_dimension_numbers<[1], [0], [0], [1], [0, 0, 1, 1], [], []>} : vector<2x128xbf16>, vector<128x128xbf16>, vector<2x128xf32> -> vector<2x128xf32>
    %c0_15 = arith.constant 0 : index
    %c0_16 = arith.constant 0 : index
    %20 = vector.load %arg7[%c0_15, %c0_16] : memref<1x128xf32, #tpu.memory_space<vmem>>, vector<1x128xf32>
    %21 = vector.broadcast %20 : vector<1x128xf32> to vector<2x128xf32>
    %22 = arith.addf %19, %21 : vector<2x128xf32>
    %23 = math.tanh %22 : vector<2x128xf32>
    %c0_17 = arith.constant 0 : index
    %c0_18 = arith.constant 0 : index
    %24 = vector.load %arg8[%c0_17, %c0_18] : memref<2x128xf32, #tpu.memory_space<vmem>>, vector<2x128xf32>
    tpu.vector_store %arg8[%c0_17, %c0_18], %23 {strides = array<i32>} : memref<2x128xf32, #tpu.memory_space<vmem>>, vector<2x128xf32>,
    return
  }
  func.func @transform_0(%arg0: i32) -> (i32, i32) {
    %c0_i32 = arith.constant 0 : i32
    %c0_i32_0 = arith.constant 0 : i32
    return %arg0, %c0_i32 : i32, i32
  }
  func.func @transform_1(%arg0: i32) -> (i32, i32) {
    %c0_i32 = arith.constant 0 : i32
    %c0_i32_0 = arith.constant 0 : i32
    %c0_i32_1 = arith.constant 0 : i32
    return %c0_i32, %c0_i32_0 : i32, i32
  }
  func.func @transform_2(%arg0: i32) -> (i32, i32) {
    %c0_i32 = arith.constant 0 : i32
    %c0_i32_0 = arith.constant 0 : i32
    %c0_i32_1 = arith.constant 0 : i32
    return %c0_i32, %c0_i32_0 : i32, i32
  }
  func.func @transform_3(%arg0: i32) -> (i32, i32) {
    %c0_i32 = arith.constant 0 : i32
    %c0_i32_0 = arith.constant 0 : i32
    %c0_i32_1 = arith.constant 0 : i32
    return %c0_i32, %c0_i32_0 : i32, i32
  }
  func.func @transform_4(%arg0: i32) -> (i32, i32) {
    %c0_i32 = arith.constant 0 : i32
    %c0_i32_0 = arith.constant 0 : i32
    %c0_i32_1 = arith.constant 0 : i32
    return %c0_i32, %c0_i32_0 : i32, i32
  }
  func.func @transform_5(%arg0: i32) -> (i32, i32) {
    %c0_i32 = arith.constant 0 : i32
    %c0_i32_0 = arith.constant 0 : i32
    %c0_i32_1 = arith.constant 0 : i32
    return %c0_i32, %c0_i32_0 : i32, i32
  }
  func.func @transform_6(%arg0: i32) -> (i32, i32) {
    %c0_i32 = arith.constant 0 : i32
    %c0_i32_0 = arith.constant 0 : i32
    %c0_i32_1 = arith.constant 0 : i32
    return %c0_i32, %c0_i32_0 : i32, i32
  }
  func.func @transform_7(%arg0: i32) -> (i32, i32) {
    %c0_i32 = arith.constant 0 : i32
    %c0_i32_0 = arith.constant 0 : i32
    return %arg0, %c0_i32 : i32, i32
  }
}

</mosaic_0001>

<bundles_post_ra>
// kernel: policy_network_forward.1
= control target key start
LH: loop header
LB: loop body
LE: loop exit
PB: predicated region body
PF: predicated region fallthrough
CT: control target
= control target key end

     0   :  { %12 = vsyncpa [#allocation3], 0  ;;  %s775_s0 = inlined_call_operand.hbm [shape: f32[2,8], index: 0, kind: input, shape index: {}]   ;;  %s776_s1 = inlined_call_operand.hbm [shape: bf16[8,256], index: 1, kind: input, shape index: {}]   ;;  %s777_s2 = inlined_call_operand.hbm [shape: f32[1,256], index: 2, kind: input, shape index: {}]   ;;  %s778_s3 = inlined_call_operand.hbm [shape: bf16[256,128], index: 3, kind: input, shape index: {}]   ;;  %s779_s4 = inlined_call_operand.vmem [shape: f32[1,128], index: 4, kind: input, shape index: {}]   ;;  %s780_s5 = inlined_call_operand.hbm [shape: bf16[128,128], index: 5, kind: input, shape index: {}]   ;;  %s781_s6 = inlined_call_operand.vmem [shape: f32[1,128], index: 6, kind: input, shape index: {}]   ;;  %s782_s7 = inlined_call_operand.hbm [shape: f32[2,128], index: 7, kind: output, shape index: {}]  }
   0x1   :  { %13 = vsyncpa [#allocation6], 0 }
   0x2   :  { %14 = vsyncpa [#allocation9], 0  ;;  %s32_s26 = sshll.u32 %s776_s1, 4  ;;  %s33_s26 = int_to_ptr.hbm [resolvable:$true] %s32_s26 }
   0x3   :  { %15 = vsyncpa [#allocation4], 0  ;;  %s703_s27 = smov [#allocation5]   ;;  %s53_s8 = sshll.u32 %s778_s3, 4  ;;  %s54_s8 = int_to_ptr.hbm [resolvable:$true] %s53_s8 }
   0x4   :  { %s34_s28 = sshll.u32 %s703_s27, 4  ;;  %s704_s9 = smov [#allocation8]   ;;  %s35_s28 = int_to_ptr.vmem [resolvable:$true] %s34_s28 }
   0x5   :  { %37 = dma.hbm_to_vmem [thread:$0]  %s33_s26, 128, %s35_s28, [#allocation6]  }
   0x6   :  { %s55_s10 = sshll.u32 %s704_s9, 4  ;;  %s705_s11 = smov 64   ;;  %s56_s10 = int_to_ptr.vmem [resolvable:$true] %s55_s10 }
   0x7   :  { %s706_s12 = smov 4   ;;  %s21_s1 = sshll.u32 %s775_s0, 4  ;;  %s22_s1 = int_to_ptr.hbm [resolvable:$true] %s21_s1 }
   0x8   :  { %61 = dma.hbm_to_vmem [thread:$0]  %s54_s8, 2048, %s56_s10, [#allocation9], %s705_s11, %s705_s11, %s706_s12  }
   0x9   :  { %s707_s15 = smov [#allocation2]   ;;  %s43_s3 = sshll.u32 %s777_s2, 4  ;;  %s44_s3 = int_to_ptr.hbm [resolvable:$true] %s43_s3 }
   0xa   :  { %s23_s16 = sshll.u32 %s707_s15, 4  ;;  %s708_s19 = smov [#allocation7]   ;;  %s24_s16 = int_to_ptr.vmem [resolvable:$true] %s23_s16 }
   0xb   :  { %26 = dma.hbm_to_vmem [thread:$0]  %s22_s1, 32, %s24_s16, [#allocation3]  }
   0xc   :  { %s45_s20 = sshll.u32 %s708_s19, 4  ;;  %s68_s23 = sshll.u32 %s780_s5, 4  ;;  %s46_s20 = int_to_ptr.vmem [resolvable:$true] %s45_s20  ;;  %s69_s23 = int_to_ptr.hbm [resolvable:$true] %s68_s23 }
   0xd   :  { %48 = dma.hbm_to_vmem [thread:$0]  %s44_s3, 32, %s46_s20, [#allocation6]  }
   0xe   :  { %s709_s0 = smov [#allocation10]  }
   0xf   :  { %s70_s24 = sshll.u32 %s709_s0, 4  ;;  %s71_s24 = int_to_ptr.vmem [resolvable:$true] %s70_s24 }
  0x10   :  { %76 = dma.hbm_to_vmem [thread:$0]  %s69_s23, 1024, %s71_s24, [#allocation9], %s705_s11, %s705_s11, %s706_s12  }
  0x11   :  { %695 = dma.done.wait [#allocation3], 32  }
  0x12   :  { %696 = vsyncadd [#allocation3], 4294967264 }
  0x13   :  { %697 = dma.done.wait [#allocation6], 160  }
  0x14   :  { %698 = vsyncadd [#allocation6], 4294967136 }
  0x15   :  { %699 = dma.done.wait [#allocation9], 3072  }
  0x16   :  { %700 = vsyncadd [#allocation9], 4294964224  ;;  %v102_v0 = vld [vmem:[#allocation5] sm:$0xff]  ;;  %vm118_vm0 = vcmask 1043456   ;;  %v100_v4 = vld [vmem:[#allocation2] sm:$0x3] }
  0x17   :  { %v522_v1 = vld [vmem:[#allocation8 + $0x38] sm:$0xff]  ;;  %v110_v2 = vunpack.c.l.b16 %v102_v0  ;;  %v111_v3 = vunpack.c.h.b16 %v102_v0  ;;  %v521_v5 = vld [vmem:[#allocation8 + $0x30] sm:$0xff]  ;;  %v101_v11 = vpack.c.bf16 %v100_v4, %v100_v4  ;;  %vm114_vm1 = vcmask 64512   ;;  %v520_v13 = vld [vmem:[#allocation8 + $0x28] sm:$0xff]  ;;  %s710_s27 = smov [#allocation11]  }
  0x18   :  { %287 = vmatpush.bf16.msra.mxu2 %v522_v1  ;;  %v530_v6 = vld [vmem:[#allocation8 + $0x78] sm:$0xff]  ;;  %v529_v9 = vld [vmem:[#allocation8 + $0x70] sm:$0xff]  ;;  %v519_v14 = vld [vmem:[#allocation8 + $0x20] sm:$0xff]  ;;  %s403_s28 = sshll.u32 %s710_s27, 4  ;;  %s404_s28 = int_to_ptr.vmem [resolvable:$true] %s403_s28 }
  0x19   :  { %v112_v7 = vpack.c.b16 %v110_v2, %v110_v2  ;;  %v113_v8 = vpack.c.b16 %v111_v3, %v111_v3  ;;  %300 = vmatpush.bf16.msra.mxu3 %v530_v6  ;;  %v518_v15 = vld [vmem:[#allocation8 + $0x18] sm:$0xff]  ;;  %v517_v16 = vld [vmem:[#allocation8 + $0x10] sm:$0xff]  ;;  %v516_v17 = vld [vmem:[#allocation8 + $0x8] sm:$0xff] }
  0x1a   :  { %v528_v18 = vld [vmem:[#allocation8 + $0x68] sm:$0xff]  ;;  %v515_v19 = vld [vmem:[#allocation8] sm:$0xff]  ;;  %v526_v21 = vld [vmem:[#allocation8 + $0x58] sm:$0xff] }
  0x1b   :  { %v120_v10 = vsel %vm118_vm0, %v112_v7, 0  ;;  %v123_v12 = vsel %vm118_vm0, %v113_v8, 0  ;;  %v527_v20 = vld [vmem:[#allocation8 + $0x60] sm:$0xff]  ;;  %v525_v22 = vld [vmem:[#allocation8 + $0x50] sm:$0xff]  ;;  %v524_v23 = vld [vmem:[#allocation8 + $0x48] sm:$0xff] }
  0x1c   :  { %132 = vmatpush.bf16.msra.mxu1 %v120_v10  ;;  %288 = vmatpush.bf16.msra.mxu2 %v521_v5  ;;  %v523_v24 = vld [vmem:[#allocation8 + $0x40] sm:$0xff]  ;;  %v538_v25 = vld [vmem:[#allocation10 + $0x38] sm:$0xff]  ;;  %v537_v27 = vld [vmem:[#allocation10 + $0x30] sm:$0xff] }
  0x1d   :  { %301 = vmatpush.bf16.msra.mxu3 %v529_v9  ;;  %v103_v26 = vld [vmem:[#allocation7] sm:$0x3]  ;;  %383 = vmatpush.bf16.msra.mxu0 %v538_v25  ;;  %v536_v40 = vld [vmem:[#allocation10 + $0x28] sm:$0xff]  ;;  %v535_v41 = vld [vmem:[#allocation10 + $0x20] sm:$0xff] }
  0x1e   :  { %v105_v28 = vperm.slane %v103_v26, 0  ;;  %v106_v34 = vperm.slane %v103_v26, 1  ;;  %v534_v42 = vld [vmem:[#allocation10 + $0x18] sm:$0xff]  ;;  %v533_v43 = vld [vmem:[#allocation10 + $0x10] sm:$0xff]  ;;  %v532_v44 = vld [vmem:[#allocation10 + $0x8] sm:$0xff] }
  0x1f   :  { %417 = vmatmul.msk.bf16.vlgmr.msra.gmra.mxu1 %vm114_vm1, %v101_v11  ;;  %v531_v45 = vld [vmem:[#allocation10] sm:$0xff]  ;;  %v547_v48 = vld [vmem:[%s779_s4] ss:$0 sm:$0xff]  ;;  %s405_s4 = sshll.u32 %s782_s7, 4  ;;  %s406_s4 = int_to_ptr.hbm [resolvable:$true] %s405_s4 }
  0x20   :  { %145 = vmatpush.bf16.msrb.mxu1 %v123_v12  ;;  %289 = vmatpush.bf16.msra.mxu2 %v520_v13  ;;  %v548_v55 = vld [vmem:[%s781_s6] ss:$0 sm:$0xff] }
  0x21   :  { %302 = vmatpush.bf16.msra.mxu3 %v528_v18  ;;  %384 = vmatpush.bf16.msra.mxu0 %v537_v27 }
  0x24   :  { %290 = vmatpush.bf16.msra.mxu2 %v519_v14 }
  0x25   :  { %303 = vmatpush.bf16.msra.mxu3 %v527_v20  ;;  %385 = vmatpush.bf16.msra.mxu0 %v536_v40 }
  0x28   :  { %291 = vmatpush.bf16.msra.mxu2 %v518_v15 }
  0x29   :  { %304 = vmatpush.bf16.msra.mxu3 %v526_v21  ;;  %386 = vmatpush.bf16.msra.mxu0 %v535_v41 }
  0x2c   :  { %292 = vmatpush.bf16.msra.mxu2 %v517_v16 }
  0x2d   :  { %305 = vmatpush.bf16.msra.mxu3 %v525_v22  ;;  %387 = vmatpush.bf16.msra.mxu0 %v534_v42 }
  0x2f   :  { %418 = vmatmul.msk.bf16.vlgmr.msrb.gmra.mxu1 %vm114_vm1, %v101_v11 }
  0x30   :  { %293 = vmatpush.bf16.msra.mxu2 %v516_v17 }
  0x31   :  { %306 = vmatpush.bf16.msra.mxu3 %v524_v23  ;;  %388 = vmatpush.bf16.msra.mxu0 %v533_v43 }
  0x34   :  { %294 = vmatpush.bf16.msra.mxu2 %v515_v19 }
  0x35   :  { %307 = vmatpush.bf16.msra.mxu3 %v523_v24  ;;  %389 = vmatpush.bf16.msra.mxu0 %v532_v44 }
  0x39   :  { %390 = vmatpush.bf16.msra.mxu0 %v531_v45 }
  0x9c   :  { %v134_v29 = vpop.f32.mrf.mxu1 }
  0x9d   :  { %v135_v30 = vadd.f32 %v134_v29, %v105_v28 }
  0x9f   :  { %v151_v31 = vmax.f32 %v135_v30, 0.0 }
  0xa1   :  { %v153_v32 = vpack.c.bf16 %v151_v31, %v151_v31 }
  0xa3   :  { %295 = vmatmul.bf16.vlgmr.msra.gmra.mxu2 %v153_v32 }
  0xa4   :  { %v136_v33 = vpop.f32.mrf.mxu1 }
  0xac   :  { %v147_v35 = vpop.f32.mrf.mxu1 }
  0xad   :  { %v148_v36 = vadd.f32 %v147_v35, %v106_v34 }
  0xaf   :  { %v152_v37 = vmax.f32 %v148_v36, 0.0 }
  0xb1   :  { %v154_v38 = vpack.c.bf16 %v152_v37, %v152_v37 }
  0xb3   :  { %308 = vmatmul.bf16.vlgmr.msra.gmra.mxu3 %v154_v38 }
  0xb4   :  { %v149_v39 = vpop.f32.mrf.mxu1 }
 0x126   :  { %v296_v46 = vpop.f32.mrf.mxu2 }
 0x127   :  { %v297_v49 = vadd.f32 %v547_v48, %v296_v46 }
 0x12e   :  { %v298_v47 = vpop.f32.mrf.mxu2 }
 0x136   :  { %v309_v50 = vpop.f32.mrf.mxu3 }
 0x137   :  { %v310_v51 = vadd.f32 %v309_v50, %v297_v49 }
 0x139   :  { %v313_v52 = vmax.f32 %v310_v51, 0.0 }
 0x13b   :  { %v314_v53 = vpack.c.bf16 %v313_v52, %v313_v52 }
 0x13d   :  { %391 = vmatmul.bf16.vlgmr.msra.gmra.mxu0 %v314_v53 }
 0x13e   :  { %v311_v54 = vpop.f32.mrf.mxu3 }
 0x1ba   :  { %v392_v56 = vpop.f32.mrf.mxu0 }
 0x1bb   :  { %v393_v57 = vadd.f32 %v548_v55, %v392_v56 }
 0x1bd   :  { %549 = vtanh.f32 %v393_v57 }
 0x1c2   :  { %v394_v58 = vpop.f32.mrf.mxu0 }
 0x1c3   :  { %v550_v59 = vpop.eup %549 }
 0x1c4   :  { %397 = vst [vmem:[#allocation11] sm:$0x3] %v550_v59 }
 0x1c5   :  { %408 = dma.vmem_to_hbm [thread:$0]  %s404_s28, 32, %s406_s4, [#allocation4]  }
 0x1c6   :  { %701 = dma.done.wait [#allocation4], 32  }
 0x1c7   :  { %702 = vsyncadd [#allocation4], 4294967264 }
 0x1c8   :  { %413 = vsyncpa [#allocation3], 1 }
 0x1c9   :  { %414 = vsyncpa [#allocation6], 1 }
 0x1ca   :  { %415 = vsyncpa [#allocation9], 1 }
 0x1cb   :  { %416 = vsyncpa [#allocation4], 1 }

</bundles_post_ra>
